<compile_context>
chip_gen: v7x
topology: tpu7x:2x2x1
jax: 0.10.0
libtpu: 0.0.40
codegen_flags: <defaults>
</compile_context>

<pallas_src>
import functools

import jax
import jax.numpy as jnp
import numpy as np
from jax.experimental import pallas as pl
from jax.experimental.pallas import tpu as pltpu


def _lstm_kernel(x_ref, wih_ref, whh_ref, b_ref, w2_ref, b2_ref,
                 out_ref, xp_scr, m_scr, *, T, B):
    """Single-invocation LSTM.

    x_ref  : (T*B, H)  embedded tokens, time-major rows
    wih_ref: (H, 4H)   W_ih^T, gate column order [i, f, o, g]
    whh_ref: (H, 4H)   W_hh^T, same gate order
    b_ref  : (1, 4H)   b_ih + b_hh, same gate order
    w2_ref : (H, Cp)   classifier weight^T, zero-padded to Cp lanes
    b2_ref : (1, Cp)   classifier bias, zero-padded
    out_ref: (T, Cp)   logits (padded); caller slices [:, :C]
    xp_scr : (T*B, 4H) hoisted input projection
    m_scr  : (T, H)    per-step relu+max rows
    """
    H = wih_ref.shape[0]

    # --- Hoisted input projection for all time steps (one big MXU matmul). ---
    xp_scr[...] = (jnp.dot(x_ref[...], wih_ref[...],
                           preferred_element_type=jnp.float32)
                   + b_ref[...])

    # --- Serial recurrence over T, fully unrolled (T is small and static). ---
    def step(t, carry):
        h, c = carry
        base = pl.multiple_of(t * B, B)
        g_x = xp_scr[pl.ds(base, B), :]                        # (B, 4H)
        gates = g_x + jnp.dot(h, whh_ref[...],
                              preferred_element_type=jnp.float32)

        sig = jax.nn.sigmoid(gates[:, : 3 * H])                # [i | f | o] slab
        g_g = jnp.tanh(gates[:, 3 * H:])                       # g gate
        i_g = sig[:, 0 * H:1 * H]
        f_g = sig[:, 1 * H:2 * H]
        o_g = sig[:, 2 * H:3 * H]

        c = f_g * c + i_g * g_g
        h = o_g * jnp.tanh(c)

        # relu + max over the batch dim -> one (1, H) row per time step.
        m_scr[pl.ds(t, 1), :] = jnp.max(jnp.maximum(h, 0.0), axis=0,
                                        keepdims=True)
        return (h, c)

    h0 = jnp.zeros((B, H), jnp.float32)
    c0 = jnp.zeros((B, H), jnp.float32)
    jax.lax.fori_loop(0, T, step, (h0, c0), unroll=True)

    # --- Deferred classifier: one lane-dense matmul + one store. ---
    out_ref[...] = (jnp.dot(m_scr[...], w2_ref[...],
                            preferred_element_type=jnp.float32)
                    + b2_ref[...])


def lstm_forward(tokens, params):
    """tokens: (T, B) int32.  Returns logits of shape (T, num_cls)."""
    emb = params["embedding"]                          # (V, H)
    # Embedding lookup (gather) kept as JAX glue; recurrence + matmuls in Pallas.
    x_emb = jnp.take(emb, tokens, axis=0)              # (T, B, H) float32
    T, B, H = x_emb.shape
    x2d = x_emb.reshape(T * B, H).astype(jnp.float32)  # (T*B, H)

    # Reorder LSTM gate blocks from PyTorch's [i, f, g, o] to [i, f, o, g] so
    # the three sigmoid gates are contiguous inside the kernel.
    perm = jnp.array([0, 1, 3, 2])

    def reorder_rows(w):                               # w: (4H, ...)
        return w.reshape(4, H, -1)[perm].reshape(4 * H, -1)

    wih_t = reorder_rows(params["w_ih"]).T.astype(jnp.float32)     # (H, 4H)
    whh_t = reorder_rows(params["w_hh"]).T.astype(jnp.float32)     # (H, 4H)
    bias = (params["b_ih"] + params["b_hh"]).reshape(4, H)[perm]
    bias = bias.reshape(1, 4 * H).astype(jnp.float32)              # (1, 4H)

    w2_t = params["w2"].T.astype(jnp.float32)          # (H, C)
    b2 = params["b2"].reshape(1, -1).astype(jnp.float32)
    C = w2_t.shape[1]
    Cp = 128 * pl.cdiv(C, 128)                         # lane-dense output width
    w2_p = jnp.zeros((H, Cp), jnp.float32).at[:, :C].set(w2_t)
    b2_p = jnp.zeros((1, Cp), jnp.float32).at[:, :C].set(b2)

    kernel = functools.partial(_lstm_kernel, T=T, B=B)

    out_p = pl.pallas_call(
        kernel,
        out_shape=jax.ShapeDtypeStruct((T, Cp), jnp.float32),
        grid=(1,),
        in_specs=[
            pl.BlockSpec((T * B, H), lambda i: (0, 0)),     # embedded input
            pl.BlockSpec((H, 4 * H), lambda i: (0, 0)),     # W_ih^T (resident)
            pl.BlockSpec((H, 4 * H), lambda i: (0, 0)),     # W_hh^T (resident)
            pl.BlockSpec((1, 4 * H), lambda i: (0, 0)),     # combined bias
            pl.BlockSpec((H, Cp), lambda i: (0, 0)),        # W2^T (padded)
            pl.BlockSpec((1, Cp), lambda i: (0, 0)),        # b2 (padded)
        ],
        out_specs=pl.BlockSpec((T, Cp), lambda i: (0, 0)),
        scratch_shapes=[
            pltpu.VMEM((T * B, 4 * H), jnp.float32),        # hoisted x-projection
            pltpu.VMEM((T, H), jnp.float32),                # relu/max rows
        ],
        compiler_params=pltpu.CompilerParams(
            dimension_semantics=("arbitrary",)),            # serial recurrence
    )(x2d, wih_t, whh_t, bias, w2_p, b2_p)

    return out_p[:, :C]


def lstm_forward_ref(tokens, params):
    """Pure-JAX reference (mirrors the PyTorch forward)."""
    emb = params["embedding"]
    x = jnp.take(emb, tokens, axis=0)                  # (T, B, H)
    T, B, H = x.shape
    w_ih, w_hh = params["w_ih"], params["w_hh"]
    b = params["b_ih"] + params["b_hh"]

    def step(carry, x_t):
        h, c = carry
        gates = x_t @ w_ih.T + h @ w_hh.T + b
        i = jax.nn.sigmoid(gates[:, 0 * H:1 * H])
        f = jax.nn.sigmoid(gates[:, 1 * H:2 * H])
        g = jnp.tanh(gates[:, 2 * H:3 * H])
        o = jax.nn.sigmoid(gates[:, 3 * H:4 * H])
        c = f * c + i * g
        h = o * jnp.tanh(c)
        return (h, c), h

    h0 = jnp.zeros((B, H), jnp.float32)
    _, hs = jax.lax.scan(step, (h0, h0), x)            # (T, B, H)
    r = jnp.maximum(hs, 0.0)
    m = jnp.max(r, axis=1)                             # max over dim=1 -> (T, H)
    return m @ params["w2"].T + params["b2"]


def init_params(key, vocab_size, hidden, num_cls):
    # hidden doubles as hidden_dim (PyTorch module only shape-checks when they match)
    k = jax.random.split(key, 7)
    s = 1.0 / np.sqrt(hidden)
    u = lambda kk, shape: jax.random.uniform(kk, shape, jnp.float32, -s, s)
    return {
        "embedding": jax.random.normal(k[0], (vocab_size, hidden), jnp.float32),
        "w_ih": u(k[1], (4 * hidden, hidden)),
        "w_hh": u(k[2], (4 * hidden, hidden)),
        "b_ih": u(k[3], (4 * hidden,)),
        "b_hh": u(k[4], (4 * hidden,)),
        "w2": u(k[5], (num_cls, hidden)),
        "b2": u(k[6], (num_cls,)),
    }


if __name__ == "__main__":
    T, B, H, V, C = 8, 8, 32, 100, 2                   # seq=8, batch=8, hidden=32, vocab=100
    key = jax.random.PRNGKey(0)
    kp, kx = jax.random.split(key)
    params = init_params(kp, V, H, C)
    tokens = jax.random.randint(kx, (T, B), 0, V, dtype=jnp.int32)

    out = jax.block_until_ready(lstm_forward(tokens, params))
    ref = jax.block_until_ready(lstm_forward_ref(tokens, params))
    np.testing.assert_allclose(np.asarray(out), np.asarray(ref), rtol=1e-5, atol=1e-5)
    assert out.shape == (T, C)
    print("KERNEL_OK")
</pallas_src>

<mosaic_0001>
module attributes {stable_mosaic.version = 11 : i64} {
  func.func @_lstm_kernel(%arg0: i32, %arg1: memref<64x32xf32, #tpu.memory_space<vmem>>, %arg2: memref<32x128xf32, #tpu.memory_space<vmem>>, %arg3: memref<32x128xf32, #tpu.memory_space<vmem>>, %arg4: memref<1x128xf32, #tpu.memory_space<vmem>>, %arg5: memref<32x128xf32, #tpu.memory_space<vmem>>, %arg6: memref<1x128xf32, #tpu.memory_space<vmem>>, %arg7: memref<8x128xf32, #tpu.memory_space<vmem>>, %arg8: memref<64x128xf32, #tpu.memory_space<vmem>>, %arg9: memref<8x32xf32, #tpu.memory_space<vmem>>) attributes {dimension_semantics = [#tpu.dimension_semantics<arbitrary>], iteration_bounds = array<i64: 1>, scalar_prefetch = 0 : i64, scratch_operands = 2 : i64, tpu.core_type = #tpu.core_type<tc>, window_params = [{pipeline_mode = #tpu.pipeline_mode<synchronous>, transform_indices = @transform_0, window_bounds = array<i64: 64, 32>}, {pipeline_mode = #tpu.pipeline_mode<synchronous>, transform_indices = @transform_1, window_bounds = array<i64: 32, 128>}, {pipeline_mode = #tpu.pipeline_mode<synchronous>, transform_indices = @transform_2, window_bounds = array<i64: 32, 128>}, {pipeline_mode = #tpu.pipeline_mode<synchronous>, transform_indices = @transform_3, window_bounds = array<i64: 1, 128>}, {pipeline_mode = #tpu.pipeline_mode<synchronous>, transform_indices = @transform_4, window_bounds = array<i64: 32, 128>}, {pipeline_mode = #tpu.pipeline_mode<synchronous>, transform_indices = @transform_5, window_bounds = array<i64: 1, 128>}, {pipeline_mode = #tpu.pipeline_mode<synchronous>, transform_indices = @transform_6, window_bounds = array<i64: 8, 128>}]} {
    %c0 = arith.constant 0 : index
    %c0_0 = arith.constant 0 : index
    %0 = vector.load %arg1[%c0, %c0_0] : memref<64x32xf32, #tpu.memory_space<vmem>>, vector<64x32xf32>
    %c0_1 = arith.constant 0 : index
    %c0_2 = arith.constant 0 : index
    %1 = vector.load %arg2[%c0_1, %c0_2] : memref<32x128xf32, #tpu.memory_space<vmem>>, vector<32x128xf32>
    %cst = arith.constant dense<0.000000e+00> : vector<64x128xf32>
    %2 = tpu.matmul %0, %1, %cst {dimension_numbers = #tpu.dot_dimension_numbers<[1], [0], [0], [1], [0, 0, 1, 1], [], []>} : vector<64x32xf32>, vector<32x128xf32>, vector<64x128xf32> -> vector<64x128xf32>
    %c0_3 = arith.constant 0 : index
    %c0_4 = arith.constant 0 : index
    %3 = vector.load %arg4[%c0_3, %c0_4] : memref<1x128xf32, #tpu.memory_space<vmem>>, vector<1x128xf32>
    %4 = vector.broadcast %3 : vector<1x128xf32> to vector<64x128xf32>
    %5 = arith.addf %2, %4 : vector<64x128xf32>
    %c0_5 = arith.constant 0 : index
    %c0_6 = arith.constant 0 : index
    %6 = vector.load %arg8[%c0_5, %c0_6] : memref<64x128xf32, #tpu.memory_space<vmem>>, vector<64x128xf32>
    tpu.vector_store %arg8[%c0_5, %c0_6], %5 {strides = array<i32>} : memref<64x128xf32, #tpu.memory_space<vmem>>, vector<64x128xf32>,
    %cst_7 = arith.constant 0.000000e+00 : f32
    %7 = vector.broadcast %cst_7 : f32 to vector<8x32xf32>
    %cst_8 = arith.constant 0.000000e+00 : f32
    %8 = vector.broadcast %cst_8 : f32 to vector<8x32xf32>
    %c0_i32 = arith.constant 0 : i32
    %c8_i32 = arith.constant 8 : i32
    %9 = arith.muli %c0_i32, %c8_i32 : i32
    %10 = tpu.assume_multiple %9, 8 : i32
    %11 = arith.index_cast %10 : i32 to index
    %c0_9 = arith.constant 0 : index
    %12 = vector.load %arg8[%11, %c0_9] : memref<64x128xf32, #tpu.memory_space<vmem>>, vector<8x128xf32>
    %c0_10 = arith.constant 0 : index
    %c0_11 = arith.constant 0 : index
    %13 = vector.load %arg3[%c0_10, %c0_11] : memref<32x128xf32, #tpu.memory_space<vmem>>, vector<32x128xf32>
    %cst_12 = arith.constant dense<0.000000e+00> : vector<8x128xf32>
    %14 = tpu.matmul %7, %13, %cst_12 {dimension_numbers = #tpu.dot_dimension_numbers<[1], [0], [0], [1], [0, 0, 1, 1], [], []>} : vector<8x32xf32>, vector<32x128xf32>, vector<8x128xf32> -> vector<8x128xf32>
    %15 = arith.addf %12, %14 : vector<8x128xf32>
    %16 = vector.extract_strided_slice %15 {offsets = [0, 0], sizes = [8, 96], strides = [1, 1]} : vector<8x128xf32> to vector<8x96xf32>
    %17 = arith.negf %16 : vector<8x96xf32>
    %18 = math.exp %17 : vector<8x96xf32>
    %cst_13 = arith.constant 1.000000e+00 : f32
    %19 = vector.broadcast %cst_13 : f32 to vector<8x96xf32>
    %20 = arith.addf %19, %18 : vector<8x96xf32>
    %21 = arith.divf %19, %20 : vector<8x96xf32>
    %22 = vector.extract_strided_slice %15 {offsets = [0, 96], sizes = [8, 32], strides = [1, 1]} : vector<8x128xf32> to vector<8x32xf32>
    %23 = math.tanh %22 : vector<8x32xf32>
    %24 = vector.extract_strided_slice %21 {offsets = [0, 0], sizes = [8, 32], strides = [1, 1]} : vector<8x96xf32> to vector<8x32xf32>
    %25 = vector.extract_strided_slice %21 {offsets = [0, 32], sizes = [8, 32], strides = [1, 1]} : vector<8x96xf32> to vector<8x32xf32>
    %26 = vector.extract_strided_slice %21 {offsets = [0, 64], sizes = [8, 32], strides = [1, 1]} : vector<8x96xf32> to vector<8x32xf32>
    %27 = arith.mulf %25, %8 : vector<8x32xf32>
    %28 = arith.mulf %24, %23 : vector<8x32xf32>
    %29 = arith.addf %27, %28 : vector<8x32xf32>
    %30 = math.tanh %29 : vector<8x32xf32>
    %31 = arith.mulf %26, %30 : vector<8x32xf32>
    %cst_14 = arith.constant 0.000000e+00 : f32
    %32 = vector.broadcast %cst_14 : f32 to vector<8x32xf32>
    %33 = arith.maximumf %31, %32 : vector<8x32xf32>
    %cst_15 = arith.constant dense<0xFF800000> : vector<32xf32>
    %34 = vector.multi_reduction <maximumf>, %33, %cst_15 [0] : vector<8x32xf32> to vector<32xf32>
    %35 = vector.shape_cast %34 : vector<32xf32> to vector<1x32xf32>
    %36 = arith.index_cast %c0_i32 : i32 to index
    %c0_16 = arith.constant 0 : index
    %37 = vector.load %arg9[%36, %c0_16] : memref<8x32xf32, #tpu.memory_space<vmem>>, vector<1x32xf32>
    tpu.vector_store %arg9[%36, %c0_16], %35 {strides = array<i32>} : memref<8x32xf32, #tpu.memory_space<vmem>>, vector<1x32xf32>,
    %c1_i32 = arith.constant 1 : i32
    %c8_i32_17 = arith.constant 8 : i32
    %38 = arith.muli %c1_i32, %c8_i32_17 : i32
    %39 = tpu.assume_multiple %38, 8 : i32
    %40 = arith.index_cast %39 : i32 to index
    %c0_18 = arith.constant 0 : index
    %41 = vector.load %arg8[%40, %c0_18] : memref<64x128xf32, #tpu.memory_space<vmem>>, vector<8x128xf32>
    %c0_19 = arith.constant 0 : index
    %c0_20 = arith.constant 0 : index
    %42 = vector.load %arg3[%c0_19, %c0_20] : memref<32x128xf32, #tpu.memory_space<vmem>>, vector<32x128xf32>
    %cst_21 = arith.constant dense<0.000000e+00> : vector<8x128xf32>
    %43 = tpu.matmul %31, %42, %cst_21 {dimension_numbers = #tpu.dot_dimension_numbers<[1], [0], [0], [1], [0, 0, 1, 1], [], []>} : vector<8x32xf32>, vector<32x128xf32>, vector<8x128xf32> -> vector<8x128xf32>
    %44 = arith.addf %41, %43 : vector<8x128xf32>
    %45 = vector.extract_strided_slice %44 {offsets = [0, 0], sizes = [8, 96], strides = [1, 1]} : vector<8x128xf32> to vector<8x96xf32>
    %46 = arith.negf %45 : vector<8x96xf32>
    %47 = math.exp %46 : vector<8x96xf32>
    %cst_22 = arith.constant 1.000000e+00 : f32
    %48 = vector.broadcast %cst_22 : f32 to vector<8x96xf32>
    %49 = arith.addf %48, %47 : vector<8x96xf32>
    %50 = arith.divf %48, %49 : vector<8x96xf32>
    %51 = vector.extract_strided_slice %44 {offsets = [0, 96], sizes = [8, 32], strides = [1, 1]} : vector<8x128xf32> to vector<8x32xf32>
    %52 = math.tanh %51 : vector<8x32xf32>
    %53 = vector.extract_strided_slice %50 {offsets = [0, 0], sizes = [8, 32], strides = [1, 1]} : vector<8x96xf32> to vector<8x32xf32>
    %54 = vector.extract_strided_slice %50 {offsets = [0, 32], sizes = [8, 32], strides = [1, 1]} : vector<8x96xf32> to vector<8x32xf32>
    %55 = vector.extract_strided_slice %50 {offsets = [0, 64], sizes = [8, 32], strides = [1, 1]} : vector<8x96xf32> to vector<8x32xf32>
    %56 = arith.mulf %54, %29 : vector<8x32xf32>
    %57 = arith.mulf %53, %52 : vector<8x32xf32>
    %58 = arith.addf %56, %57 : vector<8x32xf32>
    %59 = math.tanh %58 : vector<8x32xf32>
    %60 = arith.mulf %55, %59 : vector<8x32xf32>
    %cst_23 = arith.constant 0.000000e+00 : f32
    %61 = vector.broadcast %cst_23 : f32 to vector<8x32xf32>
    %62 = arith.maximumf %60, %61 : vector<8x32xf32>
    %cst_24 = arith.constant dense<0xFF800000> : vector<32xf32>
    %63 = vector.multi_reduction <maximumf>, %62, %cst_24 [0] : vector<8x32xf32> to vector<32xf32>
    %64 = vector.shape_cast %63 : vector<32xf32> to vector<1x32xf32>
    %65 = arith.index_cast %c1_i32 : i32 to index
    %c0_25 = arith.constant 0 : index
    %66 = vector.load %arg9[%65, %c0_25] : memref<8x32xf32, #tpu.memory_space<vmem>>, vector<1x32xf32>
    tpu.vector_store %arg9[%65, %c0_25], %64 {strides = array<i32>} : memref<8x32xf32, #tpu.memory_space<vmem>>, vector<1x32xf32>,
    %c2_i32 = arith.constant 2 : i32
    %c8_i32_26 = arith.constant 8 : i32
    %67 = arith.muli %c2_i32, %c8_i32_26 : i32
    %68 = tpu.assume_multiple %67, 8 : i32
    %69 = arith.index_cast %68 : i32 to index
    %c0_27 = arith.constant 0 : index
    %70 = vector.load %arg8[%69, %c0_27] : memref<64x128xf32, #tpu.memory_space<vmem>>, vector<8x128xf32>
    %c0_28 = arith.constant 0 : index
    %c0_29 = arith.constant 0 : index
    %71 = vector.load %arg3[%c0_28, %c0_29] : memref<32x128xf32, #tpu.memory_space<vmem>>, vector<32x128xf32>
    %cst_30 = arith.constant dense<0.000000e+00> : vector<8x128xf32>
    %72 = tpu.matmul %60, %71, %cst_30 {dimension_numbers = #tpu.dot_dimension_numbers<[1], [0], [0], [1], [0, 0, 1, 1], [], []>} : vector<8x32xf32>, vector<32x128xf32>, vector<8x128xf32> -> vector<8x128xf32>
    %73 = arith.addf %70, %72 : vector<8x128xf32>
    %74 = vector.extract_strided_slice %73 {offsets = [0, 0], sizes = [8, 96], strides = [1, 1]} : vector<8x128xf32> to vector<8x96xf32>
    %75 = arith.negf %74 : vector<8x96xf32>
    %76 = math.exp %75 : vector<8x96xf32>
    %cst_31 = arith.constant 1.000000e+00 : f32
    %77 = vector.broadcast %cst_31 : f32 to vector<8x96xf32>
    %78 = arith.addf %77, %76 : vector<8x96xf32>
    %79 = arith.divf %77, %78 : vector<8x96xf32>
    %80 = vector.extract_strided_slice %73 {offsets = [0, 96], sizes = [8, 32], strides = [1, 1]} : vector<8x128xf32> to vector<8x32xf32>
    %81 = math.tanh %80 : vector<8x32xf32>
    %82 = vector.extract_strided_slice %79 {offsets = [0, 0], sizes = [8, 32], strides = [1, 1]} : vector<8x96xf32> to vector<8x32xf32>
    %83 = vector.extract_strided_slice %79 {offsets = [0, 32], sizes = [8, 32], strides = [1, 1]} : vector<8x96xf32> to vector<8x32xf32>
    %84 = vector.extract_strided_slice %79 {offsets = [0, 64], sizes = [8, 32], strides = [1, 1]} : vector<8x96xf32> to vector<8x32xf32>
    %85 = arith.mulf %83, %58 : vector<8x32xf32>
    %86 = arith.mulf %82, %81 : vector<8x32xf32>
    %87 = arith.addf %85, %86 : vector<8x32xf32>
    %88 = math.tanh %87 : vector<8x32xf32>
    %89 = arith.mulf %84, %88 : vector<8x32xf32>
    %cst_32 = arith.constant 0.000000e+00 : f32
    %90 = vector.broadcast %cst_32 : f32 to vector<8x32xf32>
    %91 = arith.maximumf %89, %90 : vector<8x32xf32>
    %cst_33 = arith.constant dense<0xFF800000> : vector<32xf32>
    %92 = vector.multi_reduction <maximumf>, %91, %cst_33 [0] : vector<8x32xf32> to vector<32xf32>
    %93 = vector.shape_cast %92 : vector<32xf32> to vector<1x32xf32>
    %94 = arith.index_cast %c2_i32 : i32 to index
    %c0_34 = arith.constant 0 : index
    %95 = vector.load %arg9[%94, %c0_34] : memref<8x32xf32, #tpu.memory_space<vmem>>, vector<1x32xf32>
    tpu.vector_store %arg9[%94, %c0_34], %93 {strides = array<i32>} : memref<8x32xf32, #tpu.memory_space<vmem>>, vector<1x32xf32>,
    %c3_i32 = arith.constant 3 : i32
    %c8_i32_35 = arith.constant 8 : i32
    %96 = arith.muli %c3_i32, %c8_i32_35 : i32
    %97 = tpu.assume_multiple %96, 8 : i32
    %98 = arith.index_cast %97 : i32 to index
    %c0_36 = arith.constant 0 : index
    %99 = vector.load %arg8[%98, %c0_36] : memref<64x128xf32, #tpu.memory_space<vmem>>, vector<8x128xf32>
    %c0_37 = arith.constant 0 : index
    %c0_38 = arith.constant 0 : index
    %100 = vector.load %arg3[%c0_37, %c0_38] : memref<32x128xf32, #tpu.memory_space<vmem>>, vector<32x128xf32>
    %cst_39 = arith.constant dense<0.000000e+00> : vector<8x128xf32>
    %101 = tpu.matmul %89, %100, %cst_39 {dimension_numbers = #tpu.dot_dimension_numbers<[1], [0], [0], [1], [0, 0, 1, 1], [], []>} : vector<8x32xf32>, vector<32x128xf32>, vector<8x128xf32> -> vector<8x128xf32>
    %102 = arith.addf %99, %101 : vector<8x128xf32>
    %103 = vector.extract_strided_slice %102 {offsets = [0, 0], sizes = [8, 96], strides = [1, 1]} : vector<8x128xf32> to vector<8x96xf32>
    %104 = arith.negf %103 : vector<8x96xf32>
    %105 = math.exp %104 : vector<8x96xf32>
    %cst_40 = arith.constant 1.000000e+00 : f32
    %106 = vector.broadcast %cst_40 : f32 to vector<8x96xf32>
    %107 = arith.addf %106, %105 : vector<8x96xf32>
    %108 = arith.divf %106, %107 : vector<8x96xf32>
    %109 = vector.extract_strided_slice %102 {offsets = [0, 96], sizes = [8, 32], strides = [1, 1]} : vector<8x128xf32> to vector<8x32xf32>
    %110 = math.tanh %109 : vector<8x32xf32>
    %111 = vector.extract_strided_slice %108 {offsets = [0, 0], sizes = [8, 32], strides = [1, 1]} : vector<8x96xf32> to vector<8x32xf32>
    %112 = vector.extract_strided_slice %108 {offsets = [0, 32], sizes = [8, 32], strides = [1, 1]} : vector<8x96xf32> to vector<8x32xf32>
    %113 = vector.extract_strided_slice %108 {offsets = [0, 64], sizes = [8, 32], strides = [1, 1]} : vector<8x96xf32> to vector<8x32xf32>
    %114 = arith.mulf %112, %87 : vector<8x32xf32>
    %115 = arith.mulf %111, %110 : vector<8x32xf32>
    %116 = arith.addf %114, %115 : vector<8x32xf32>
    %117 = math.tanh %116 : vector<8x32xf32>
    %118 = arith.mulf %113, %117 : vector<8x32xf32>
    %cst_41 = arith.constant 0.000000e+00 : f32
    %119 = vector.broadcast %cst_41 : f32 to vector<8x32xf32>
    %120 = arith.maximumf %118, %119 : vector<8x32xf32>
    %cst_42 = arith.constant dense<0xFF800000> : vector<32xf32>
    %121 = vector.multi_reduction <maximumf>, %120, %cst_42 [0] : vector<8x32xf32> to vector<32xf32>
    %122 = vector.shape_cast %121 : vector<32xf32> to vector<1x32xf32>
    %123 = arith.index_cast %c3_i32 : i32 to index
    %c0_43 = arith.constant 0 : index
    %124 = vector.load %arg9[%123, %c0_43] : memref<8x32xf32, #tpu.memory_space<vmem>>, vector<1x32xf32>
    tpu.vector_store %arg9[%123, %c0_43], %122 {strides = array<i32>} : memref<8x32xf32, #tpu.memory_space<vmem>>, vector<1x32xf32>,
    %c4_i32 = arith.constant 4 : i32
    %c8_i32_44 = arith.constant 8 : i32
    %125 = arith.muli %c4_i32, %c8_i32_44 : i32
    %126 = tpu.assume_multiple %125, 8 : i32
    %127 = arith.index_cast %126 : i32 to index
    %c0_45 = arith.constant 0 : index
    %128 = vector.load %arg8[%127, %c0_45] : memref<64x128xf32, #tpu.memory_space<vmem>>, vector<8x128xf32>
    %c0_46 = arith.constant 0 : index
    %c0_47 = arith.constant 0 : index
    %129 = vector.load %arg3[%c0_46, %c0_47] : memref<32x128xf32, #tpu.memory_space<vmem>>, vector<32x128xf32>
    %cst_48 = arith.constant dense<0.000000e+00> : vector<8x128xf32>
    %130 = tpu.matmul %118, %129, %cst_48 {dimension_numbers = #tpu.dot_dimension_numbers<[1], [0], [0], [1], [0, 0, 1, 1], [], []>} : vector<8x32xf32>, vector<32x128xf32>, vector<8x128xf32> -> vector<8x128xf32>
    %131 = arith.addf %128, %130 : vector<8x128xf32>
    %132 = vector.extract_strided_slice %131 {offsets = [0, 0], sizes = [8, 96], strides = [1, 1]} : vector<8x128xf32> to vector<8x96xf32>
    %133 = arith.negf %132 : vector<8x96xf32>
    %134 = math.exp %133 : vector<8x96xf32>
    %cst_49 = arith.constant 1.000000e+00 : f32
    %135 = vector.broadcast %cst_49 : f32 to vector<8x96xf32>
    %136 = arith.addf %135, %134 : vector<8x96xf32>
    %137 = arith.divf %135, %136 : vector<8x96xf32>
    %138 = vector.extract_strided_slice %131 {offsets = [0, 96], sizes = [8, 32], strides = [1, 1]} : vector<8x128xf32> to vector<8x32xf32>
    %139 = math.tanh %138 : vector<8x32xf32>
    %140 = vector.extract_strided_slice %137 {offsets = [0, 0], sizes = [8, 32], strides = [1, 1]} : vector<8x96xf32> to vector<8x32xf32>
    %141 = vector.extract_strided_slice %137 {offsets = [0, 32], sizes = [8, 32], strides = [1, 1]} : vector<8x96xf32> to vector<8x32xf32>
    %142 = vector.extract_strided_slice %137 {offsets = [0, 64], sizes = [8, 32], strides = [1, 1]} : vector<8x96xf32> to vector<8x32xf32>
    %143 = arith.mulf %141, %116 : vector<8x32xf32>
    %144 = arith.mulf %140, %139 : vector<8x32xf32>
    %145 = arith.addf %143, %144 : vector<8x32xf32>
    %146 = math.tanh %145 : vector<8x32xf32>
    %147 = arith.mulf %142, %146 : vector<8x32xf32>
    %cst_50 = arith.constant 0.000000e+00 : f32
    %148 = vector.broadcast %cst_50 : f32 to vector<8x32xf32>
    %149 = arith.maximumf %147, %148 : vector<8x32xf32>
    %cst_51 = arith.constant dense<0xFF800000> : vector<32xf32>
    %150 = vector.multi_reduction <maximumf>, %149, %cst_51 [0] : vector<8x32xf32> to vector<32xf32>
    %151 = vector.shape_cast %150 : vector<32xf32> to vector<1x32xf32>
    %152 = arith.index_cast %c4_i32 : i32 to index
    %c0_52 = arith.constant 0 : index
    %153 = vector.load %arg9[%152, %c0_52] : memref<8x32xf32, #tpu.memory_space<vmem>>, vector<1x32xf32>
    tpu.vector_store %arg9[%152, %c0_52], %151 {strides = array<i32>} : memref<8x32xf32, #tpu.memory_space<vmem>>, vector<1x32xf32>,
    %c5_i32 = arith.constant 5 : i32
    %c8_i32_53 = arith.constant 8 : i32
    %154 = arith.muli %c5_i32, %c8_i32_53 : i32
    %155 = tpu.assume_multiple %154, 8 : i32
    %156 = arith.index_cast %155 : i32 to index
    %c0_54 = arith.constant 0 : index
    %157 = vector.load %arg8[%156, %c0_54] : memref<64x128xf32, #tpu.memory_space<vmem>>, vector<8x128xf32>
    %c0_55 = arith.constant 0 : index
    %c0_56 = arith.constant 0 : index
    %158 = vector.load %arg3[%c0_55, %c0_56] : memref<32x128xf32, #tpu.memory_space<vmem>>, vector<32x128xf32>
    %cst_57 = arith.constant dense<0.000000e+00> : vector<8x128xf32>
    %159 = tpu.matmul %147, %158, %cst_57 {dimension_numbers = #tpu.dot_dimension_numbers<[1], [0], [0], [1], [0, 0, 1, 1], [], []>} : vector<8x32xf32>, vector<32x128xf32>, vector<8x128xf32> -> vector<8x128xf32>
    %160 = arith.addf %157, %159 : vector<8x128xf32>
    %161 = vector.extract_strided_slice %160 {offsets = [0, 0], sizes = [8, 96], strides = [1, 1]} : vector<8x128xf32> to vector<8x96xf32>
    %162 = arith.negf %161 : vector<8x96xf32>
    %163 = math.exp %162 : vector<8x96xf32>
    %cst_58 = arith.constant 1.000000e+00 : f32
    %164 = vector.broadcast %cst_58 : f32 to vector<8x96xf32>
    %165 = arith.addf %164, %163 : vector<8x96xf32>
    %166 = arith.divf %164, %165 : vector<8x96xf32>
    %167 = vector.extract_strided_slice %160 {offsets = [0, 96], sizes = [8, 32], strides = [1, 1]} : vector<8x128xf32> to vector<8x32xf32>
    %168 = math.tanh %167 : vector<8x32xf32>
    %169 = vector.extract_strided_slice %166 {offsets = [0, 0], sizes = [8, 32], strides = [1, 1]} : vector<8x96xf32> to vector<8x32xf32>
    %170 = vector.extract_strided_slice %166 {offsets = [0, 32], sizes = [8, 32], strides = [1, 1]} : vector<8x96xf32> to vector<8x32xf32>
    %171 = vector.extract_strided_slice %166 {offsets = [0, 64], sizes = [8, 32], strides = [1, 1]} : vector<8x96xf32> to vector<8x32xf32>
    %172 = arith.mulf %170, %145 : vector<8x32xf32>
    %173 = arith.mulf %169, %168 : vector<8x32xf32>
    %174 = arith.addf %172, %173 : vector<8x32xf32>
    %175 = math.tanh %174 : vector<8x32xf32>
    %176 = arith.mulf %171, %175 : vector<8x32xf32>
    %cst_59 = arith.constant 0.000000e+00 : f32
    %177 = vector.broadcast %cst_59 : f32 to vector<8x32xf32>
    %178 = arith.maximumf %176, %177 : vector<8x32xf32>
    %cst_60 = arith.constant dense<0xFF800000> : vector<32xf32>
    %179 = vector.multi_reduction <maximumf>, %178, %cst_60 [0] : vector<8x32xf32> to vector<32xf32>
    %180 = vector.shape_cast %179 : vector<32xf32> to vector<1x32xf32>
    %181 = arith.index_cast %c5_i32 : i32 to index
    %c0_61 = arith.constant 0 : index
    %182 = vector.load %arg9[%181, %c0_61] : memref<8x32xf32, #tpu.memory_space<vmem>>, vector<1x32xf32>
    tpu.vector_store %arg9[%181, %c0_61], %180 {strides = array<i32>} : memref<8x32xf32, #tpu.memory_space<vmem>>, vector<1x32xf32>,
    %c6_i32 = arith.constant 6 : i32
    %c8_i32_62 = arith.constant 8 : i32
    %183 = arith.muli %c6_i32, %c8_i32_62 : i32
    %184 = tpu.assume_multiple %183, 8 : i32
    %185 = arith.index_cast %184 : i32 to index
    %c0_63 = arith.constant 0 : index
    %186 = vector.load %arg8[%185, %c0_63] : memref<64x128xf32, #tpu.memory_space<vmem>>, vector<8x128xf32>
    %c0_64 = arith.constant 0 : index
    %c0_65 = arith.constant 0 : index
    %187 = vector.load %arg3[%c0_64, %c0_65] : memref<32x128xf32, #tpu.memory_space<vmem>>, vector<32x128xf32>
    %cst_66 = arith.constant dense<0.000000e+00> : vector<8x128xf32>
    %188 = tpu.matmul %176, %187, %cst_66 {dimension_numbers = #tpu.dot_dimension_numbers<[1], [0], [0], [1], [0, 0, 1, 1], [], []>} : vector<8x32xf32>, vector<32x128xf32>, vector<8x128xf32> -> vector<8x128xf32>
    %189 = arith.addf %186, %188 : vector<8x128xf32>
    %190 = vector.extract_strided_slice %189 {offsets = [0, 0], sizes = [8, 96], strides = [1, 1]} : vector<8x128xf32> to vector<8x96xf32>
    %191 = arith.negf %190 : vector<8x96xf32>
    %192 = math.exp %191 : vector<8x96xf32>
    %cst_67 = arith.constant 1.000000e+00 : f32
    %193 = vector.broadcast %cst_67 : f32 to vector<8x96xf32>
    %194 = arith.addf %193, %192 : vector<8x96xf32>
    %195 = arith.divf %193, %194 : vector<8x96xf32>
    %196 = vector.extract_strided_slice %189 {offsets = [0, 96], sizes = [8, 32], strides = [1, 1]} : vector<8x128xf32> to vector<8x32xf32>
    %197 = math.tanh %196 : vector<8x32xf32>
    %198 = vector.extract_strided_slice %195 {offsets = [0, 0], sizes = [8, 32], strides = [1, 1]} : vector<8x96xf32> to vector<8x32xf32>
    %199 = vector.extract_strided_slice %195 {offsets = [0, 32], sizes = [8, 32], strides = [1, 1]} : vector<8x96xf32> to vector<8x32xf32>
    %200 = vector.extract_strided_slice %195 {offsets = [0, 64], sizes = [8, 32], strides = [1, 1]} : vector<8x96xf32> to vector<8x32xf32>
    %201 = arith.mulf %199, %174 : vector<8x32xf32>
    %202 = arith.mulf %198, %197 : vector<8x32xf32>
    %203 = arith.addf %201, %202 : vector<8x32xf32>
    %204 = math.tanh %203 : vector<8x32xf32>
    %205 = arith.mulf %200, %204 : vector<8x32xf32>
    %cst_68 = arith.constant 0.000000e+00 : f32
    %206 = vector.broadcast %cst_68 : f32 to vector<8x32xf32>
    %207 = arith.maximumf %205, %206 : vector<8x32xf32>
    %cst_69 = arith.constant dense<0xFF800000> : vector<32xf32>
    %208 = vector.multi_reduction <maximumf>, %207, %cst_69 [0] : vector<8x32xf32> to vector<32xf32>
    %209 = vector.shape_cast %208 : vector<32xf32> to vector<1x32xf32>
    %210 = arith.index_cast %c6_i32 : i32 to index
    %c0_70 = arith.constant 0 : index
    %211 = vector.load %arg9[%210, %c0_70] : memref<8x32xf32, #tpu.memory_space<vmem>>, vector<1x32xf32>
    tpu.vector_store %arg9[%210, %c0_70], %209 {strides = array<i32>} : memref<8x32xf32, #tpu.memory_space<vmem>>, vector<1x32xf32>,
    %c7_i32 = arith.constant 7 : i32
    %c8_i32_71 = arith.constant 8 : i32
    %212 = arith.muli %c7_i32, %c8_i32_71 : i32
    %213 = tpu.assume_multiple %212, 8 : i32
    %214 = arith.index_cast %213 : i32 to index
    %c0_72 = arith.constant 0 : index
    %215 = vector.load %arg8[%214, %c0_72] : memref<64x128xf32, #tpu.memory_space<vmem>>, vector<8x128xf32>
    %c0_73 = arith.constant 0 : index
    %c0_74 = arith.constant 0 : index
    %216 = vector.load %arg3[%c0_73, %c0_74] : memref<32x128xf32, #tpu.memory_space<vmem>>, vector<32x128xf32>
    %cst_75 = arith.constant dense<0.000000e+00> : vector<8x128xf32>
    %217 = tpu.matmul %205, %216, %cst_75 {dimension_numbers = #tpu.dot_dimension_numbers<[1], [0], [0], [1], [0, 0, 1, 1], [], []>} : vector<8x32xf32>, vector<32x128xf32>, vector<8x128xf32> -> vector<8x128xf32>
    %218 = arith.addf %215, %217 : vector<8x128xf32>
    %219 = vector.extract_strided_slice %218 {offsets = [0, 0], sizes = [8, 96], strides = [1, 1]} : vector<8x128xf32> to vector<8x96xf32>
    %220 = arith.negf %219 : vector<8x96xf32>
    %221 = math.exp %220 : vector<8x96xf32>
    %cst_76 = arith.constant 1.000000e+00 : f32
    %222 = vector.broadcast %cst_76 : f32 to vector<8x96xf32>
    %223 = arith.addf %222, %221 : vector<8x96xf32>
    %224 = arith.divf %222, %223 : vector<8x96xf32>
    %225 = vector.extract_strided_slice %218 {offsets = [0, 96], sizes = [8, 32], strides = [1, 1]} : vector<8x128xf32> to vector<8x32xf32>
    %226 = math.tanh %225 : vector<8x32xf32>
    %227 = vector.extract_strided_slice %224 {offsets = [0, 0], sizes = [8, 32], strides = [1, 1]} : vector<8x96xf32> to vector<8x32xf32>
    %228 = vector.extract_strided_slice %224 {offsets = [0, 32], sizes = [8, 32], strides = [1, 1]} : vector<8x96xf32> to vector<8x32xf32>
    %229 = vector.extract_strided_slice %224 {offsets = [0, 64], sizes = [8, 32], strides = [1, 1]} : vector<8x96xf32> to vector<8x32xf32>
    %230 = arith.mulf %228, %203 : vector<8x32xf32>
    %231 = arith.mulf %227, %226 : vector<8x32xf32>
    %232 = arith.addf %230, %231 : vector<8x32xf32>
    %233 = math.tanh %232 : vector<8x32xf32>
    %234 = arith.mulf %229, %233 : vector<8x32xf32>
    %cst_77 = arith.constant 0.000000e+00 : f32
    %235 = vector.broadcast %cst_77 : f32 to vector<8x32xf32>
    %236 = arith.maximumf %234, %235 : vector<8x32xf32>
    %cst_78 = arith.constant dense<0xFF800000> : vector<32xf32>
    %237 = vector.multi_reduction <maximumf>, %236, %cst_78 [0] : vector<8x32xf32> to vector<32xf32>
    %238 = vector.shape_cast %237 : vector<32xf32> to vector<1x32xf32>
    %239 = arith.index_cast %c7_i32 : i32 to index
    %c0_79 = arith.constant 0 : index
    %240 = vector.load %arg9[%239, %c0_79] : memref<8x32xf32, #tpu.memory_space<vmem>>, vector<1x32xf32>
    tpu.vector_store %arg9[%239, %c0_79], %238 {strides = array<i32>} : memref<8x32xf32, #tpu.memory_space<vmem>>, vector<1x32xf32>,
    %c8_i32_80 = arith.constant 8 : i32
    %c0_81 = arith.constant 0 : index
    %c0_82 = arith.constant 0 : index
    %241 = vector.load %arg9[%c0_81, %c0_82] : memref<8x32xf32, #tpu.memory_space<vmem>>, vector<8x32xf32>
    %c0_83 = arith.constant 0 : index
    %c0_84 = arith.constant 0 : index
    %242 = vector.load %arg5[%c0_83, %c0_84] : memref<32x128xf32, #tpu.memory_space<vmem>>, vector<32x128xf32>
    %cst_85 = arith.constant dense<0.000000e+00> : vector<8x128xf32>
    %243 = tpu.matmul %241, %242, %cst_85 {dimension_numbers = #tpu.dot_dimension_numbers<[1], [0], [0], [1], [0, 0, 1, 1], [], []>} : vector<8x32xf32>, vector<32x128xf32>, vector<8x128xf32> -> vector<8x128xf32>
    %c0_86 = arith.constant 0 : index
    %c0_87 = arith.constant 0 : index
    %244 = vector.load %arg6[%c0_86, %c0_87] : memref<1x128xf32, #tpu.memory_space<vmem>>, vector<1x128xf32>
    %245 = vector.broadcast %244 : vector<1x128xf32> to vector<8x128xf32>
    %246 = arith.addf %243, %245 : vector<8x128xf32>
    %c0_88 = arith.constant 0 : index
    %c0_89 = arith.constant 0 : index
    %247 = vector.load %arg7[%c0_88, %c0_89] : memref<8x128xf32, #tpu.memory_space<vmem>>, vector<8x128xf32>
    tpu.vector_store %arg7[%c0_88, %c0_89], %246 {strides = array<i32>} : memref<8x128xf32, #tpu.memory_space<vmem>>, vector<8x128xf32>,
    return
  }
  func.func @transform_0(%arg0: i32) -> (i32, i32) {
    %c0_i32 = arith.constant 0 : i32
    %c0_i32_0 = arith.constant 0 : i32
    %c0_i32_1 = arith.constant 0 : i32
    return %c0_i32, %c0_i32_0 : i32, i32
  }
  func.func @transform_1(%arg0: i32) -> (i32, i32) {
    %c0_i32 = arith.constant 0 : i32
    %c0_i32_0 = arith.constant 0 : i32
    %c0_i32_1 = arith.constant 0 : i32
    return %c0_i32, %c0_i32_0 : i32, i32
  }
  func.func @transform_2(%arg0: i32) -> (i32, i32) {
    %c0_i32 = arith.constant 0 : i32
    %c0_i32_0 = arith.constant 0 : i32
    %c0_i32_1 = arith.constant 0 : i32
    return %c0_i32, %c0_i32_0 : i32, i32
  }
  func.func @transform_3(%arg0: i32) -> (i32, i32) {
    %c0_i32 = arith.constant 0 : i32
    %c0_i32_0 = arith.constant 0 : i32
    %c0_i32_1 = arith.constant 0 : i32
    return %c0_i32, %c0_i32_0 : i32, i32
  }
  func.func @transform_4(%arg0: i32) -> (i32, i32) {
    %c0_i32 = arith.constant 0 : i32
    %c0_i32_0 = arith.constant 0 : i32
    %c0_i32_1 = arith.constant 0 : i32
    return %c0_i32, %c0_i32_0 : i32, i32
  }
  func.func @transform_5(%arg0: i32) -> (i32, i32) {
    %c0_i32 = arith.constant 0 : i32
    %c0_i32_0 = arith.constant 0 : i32
    %c0_i32_1 = arith.constant 0 : i32
    return %c0_i32, %c0_i32_0 : i32, i32
  }
  func.func @transform_6(%arg0: i32) -> (i32, i32) {
    %c0_i32 = arith.constant 0 : i32
    %c0_i32_0 = arith.constant 0 : i32
    %c0_i32_1 = arith.constant 0 : i32
    return %c0_i32, %c0_i32_0 : i32, i32
  }
}

</mosaic_0001>

<bundles_post_ra>
// kernel: tpu_custom_call.1
= control target key start
LH: loop header
LB: loop body
LE: loop exit
PB: predicated region body
PF: predicated region fallthrough
CT: control target
= control target key end

     0   :  { %vm43_vm0 = vcmask 261120   ;;  %v1590_v4 = vmov 0.0|0.0   ;;  %vm1591_vm1 = vmmov 0   ;;  %v1592_v13 = vmov 0.0   ;;  %s1892_s0 = inlined_call_operand.vmem [shape: f32[64,32], index: 0, kind: input, shape index: {}]   ;;  %s1893_s1 = inlined_call_operand.vmem [shape: f32[32,128], index: 1, kind: input, shape index: {}]   ;;  %s1894_s2 = inlined_call_operand.vmem [shape: f32[32,128], index: 2, kind: input, shape index: {}]   ;;  %s1895_s3 = inlined_call_operand.vmem [shape: f32[1,128], index: 3, kind: input, shape index: {}]   ;;  %s1896_s4 = inlined_call_operand.vmem [shape: f32[32,128], index: 4, kind: input, shape index: {}]   ;;  %s1897_s5 = inlined_call_operand.vmem [shape: f32[1,128], index: 5, kind: input, shape index: {}]   ;;  %s1898_s6 = inlined_call_operand.hbm [shape: f32[8,128], index: 6, kind: output, shape index: {}]  }
   0x1   :  { %v32_v0 = vld [vmem:[%s1893_s1] sm:$0xff]  ;;  %v33_v1 = vld [vmem:[%s1893_s1 + $0x8] sm:$0xff]  ;;  %1442 = vmatprep.subr.bf16.mxu1 %v1590_v4  ;;  %v34_v6 = vld [vmem:[%s1893_s1 + $0x10] sm:$0xff]  ;;  %1343 = vmatprep.mubr.msk.f32.mxu1 %vm1591_vm1, %v1592_v13 }
   0x2   :  { %v182_v2 = vld [vmem:[%s1894_s2] sm:$0xff]  ;;  %v1434_v3 = vpack.c.bf16 %v33_v1, %v32_v0  ;;  %v183_v5 = vld [vmem:[%s1894_s2 + $0x8] sm:$0xff]  ;;  %v35_v7 = vld [vmem:[%s1893_s1 + $0x18] sm:$0xff] }
   0x3   :  { %v1650_v8 = vpack.c.bf16 %v183_v5, %v182_v2  ;;  %v1438_v9 = vpack.c.bf16 %v35_v7, %v34_v6  ;;  %v24_v10 = vld [vmem:[%s1892_s0] sm:$0xff]  ;;  %v184_v11 = vld [vmem:[%s1894_s2 + $0x10] sm:$0xff]  ;;  %v185_v12 = vld [vmem:[%s1894_s2 + $0x18] sm:$0xff] }
   0x4   :  { %1435 = vmatprep.subr.bf16.mxu0 %v1434_v3  ;;  %1323 = vmatprep.mubr.msk.f32.mxu0 %vm43_vm0, %v24_v10 }
   0x5   :  { %11 = vsyncpa [#allocation5], 0  ;;  %1437 = vmatpush3.bf16.msra.mxu0 %v1434_v3  ;;  %1444 = vmatpush3.bf16.msra.mxu1 %v1650_v8  ;;  %v1665_v14 = vpack.c.bf16 %v185_v12, %v184_v11  ;;  %v25_v15 = vld [vmem:[%s1892_s0 + $0x8] sm:$0xff]  ;;  %v1689_v16 = vld [vmem:[%s1895_s3] ss:$0 sm:$0xff]  ;;  %s1593_s17 = smov 32  }
   0x6   :  { %1439 = vmatprep.subr.bf16.mxu0 %v1438_v9  ;;  %1445 = vmatprep.subr.bf16.mxu1 %v1590_v4  ;;  %s1594_s3 = smov 64   ;;  %v26_v51 = vld [vmem:[%s1892_s0 + $0x10] sm:$0xff]  ;;  %v27_v52 = vld [vmem:[%s1892_s0 + $0x18] sm:$0xff]  ;;  %v28_v53 = vld [vmem:[%s1892_s0 + $0x20] sm:$0xff]  ;;  %vm285_vm2 = vcmask 785920   ;;  %vm297_vm3 = vcmask 253952  }
   0x7   :  { %v29_v55 = vld [vmem:[%s1892_s0 + $0x28] sm:$0xff]  ;;  %v30_v56 = vld [vmem:[%s1892_s0 + $0x30] sm:$0xff]  ;;  %v31_v57 = vld [vmem:[%s1892_s0 + $0x38] sm:$0xff]  ;;  %s1595_s14 = smov [#allocation4]  }
   0x8   :  { %s1224_s1 = sshll.u32 %s1595_s14, 4  ;;  %s1225_s1 = int_to_ptr.vmem [resolvable:$true] %s1224_s1 }
   0x9   :  { %1441 = vmatpush3.bf16.msra.mxu0 %v1438_v9  ;;  %1447 = vmatpush3.bf16.msra.mxu1 %v1665_v14  ;;  %s1566_s2 = scalar_lea.vmem %s1225_s1, 128  ;;  %p1571_p1 = scmp.lt.s32.totalorder %s1225_s1, %s1225_s1 }
   0xa   :  { %1448 = vmatprep.subr.bf16.mxu1 %v1590_v4  ;;  %1454 = vmatprep.subr.bf16.mxu0 %v1590_v4  ;;  %p1567_p0 = scmp.ne.s32.totalorder %s1225_s1, %s1566_s2  ;;  %p1572_p2 = scmp.lt.s32.totalorder %s1566_s2, %s1566_s2 }
   0xc   :  { %1324 = vmatmul.mubr.msk.f32.vlgmr.msra.gmra.mrb[0].mxu0 %vm43_vm0, %v25_v15  ;;  %1344 = vmatmul.mubr.f32.vlgmr.msra.gmra.mrb[0].mxu1 %v1592_v13  ;;  %p1573_p3 = por %p1572_p2, %p1571_p1 }
   0xd   :  { %1450 = vmatpush3.bf16.msra.mxu1 %v1650_v8  ;;  %1354 = vmatprep.mubr.msk.f32.mxu1 %vm1591_vm1, %v1592_v13 }
   0xe   :  { %1451 = vmatprep.subr.bf16.mxu1 %v1590_v4  ;;  %1456 = vmatpush3.bf16.msra.mxu0 %v1650_v8  ;;  %p1574_p4 = pnand %p1573_p3, %p1567_p0 }
   0xf   :  { %1457 = vmatprep.subr.bf16.mxu0 %v1590_v4  ;;  %1326 = vmatprep.mubr.msk.f32.mxu0 %vm43_vm0, %v26_v51 }
  0x10   :  { %1327 = vmatmul.mubr.msk.f32.gmra.mrb[2].mxu0 %vm43_vm0, %v27_v52 }
  0x11   :  { %1453 = vmatpush3.bf16.msra.mxu1 %v1665_v14  ;;  %1329 = vmatprep.mubr.msk.f32.mxu0 %vm43_vm0, %v28_v53 }
  0x12   :  { %1459 = vmatpush3.bf16.msra.mxu0 %v1665_v14  ;;  %1460 = vmatprep.subr.bf16.mxu1 %v1590_v4 }
  0x13   :  { %1466 = vmatprep.subr.bf16.mxu0 %v1590_v4 }
  0x14   :  { %1330 = vmatmul.mubr.msk.f32.gmra.mrb[4].mxu0 %vm43_vm0, %v29_v55 }
  0x15   :  { %1332 = vmatprep.mubr.msk.f32.mxu0 %vm43_vm0, %v30_v56 }
  0x18   :  { %1333 = vmatmul.mubr.msk.f32.gmra.mrb[6].mxu0 %vm43_vm0, %v31_v57 }
  0x19   :  { %1365 = vmatprep.mubr.msk.f32.mxu0 %vm1591_vm1, %v1592_v13 }
  0xdf   :  { %v1325_v17 = vpop.f32.mrb[0].mxu0  ;;  %v255_v18 = vpop.f32.mrb[0].mxu1 }
  0xe0   :  { %v134_v19 = vpop.f32.mrb[1].mxu0  ;;  %v1345_v20 = vpop.f32.mrb[1].mxu1  ;;  %v140_v37 = vadd.f32 %v1325_v17, %v1689_v16 }
  0xe1   :  { %v135_v21 = vadd.f32 %v1689_v16, %v134_v19 }
  0xe3   :  { %v259_v22 = vadd.f32 %v255_v18, %v135_v21  ;;  %v1328_v60 = vpop.f32.mrb[2].mxu0 }
  0xe4   :  { %v144_v61 = vpop.f32.mrb[3].mxu0 }
  0xe5   :  { %1502 = vtanh.f32 %v259_v22  ;;  %v1241_v24 = vmul.f32 -1.442695, %v259_v22  ;;  %v145_v3 = vadd.f32 %v1689_v16, %v144_v61 }
  0xe7   :  { %1504 = vpow2.f32 %v1241_v24  ;;  %v1740_v62 = vpop.f32.mrb[4].mxu0 }
  0xe8   :  { %v1742_v63 = vpop.f32.mrb[5].mxu0 }
  0xeb   :  { %v1744_v0 = vpop.f32.mrb[6].mxu0 }
  0xec   :  { %v1746_v1 = vpop.f32.mrb[7].mxu0 }
  0xef   :  { %v1503_v23 = vpop.eup %1502 }
  0xf0   :  { %269 = vrot.lane.b32.xlu0 %v1503_v23, %s1593_s17 }
  0xf1   :  { %v1505_v25 = vpop.eup %1504 }
  0xf2   :  { %v263_v26 = vadd.f32 1.0, %v1505_v25 }
  0xf4   :  { %1506 = vrcp.f32 %v263_v26  ;;  %v150_v26 = vadd.f32 %v1328_v60, %v1689_v16 }
  0xfe   :  { %v1507_v27 = vpop.eup %1506 }
  0xff   :  { %v267_v30 = vmul.f32 0.0, %v1507_v27 }
 0x162   :  { %v270_v28 = vpop.permute.xlu0 %269 }
 0x163   :  { %v272_v29 = vmul.f32 %v1507_v27, %v270_v28 }
 0x165   :  { %274 = vrot.lane.b32.xlu0 %v272_v29, %s1593_s17 }
 0x1d7   :  { %v275_v31 = vpop.permute.xlu0 %274 }
 0x1d8   :  { %v277_v32 = vadd.f32 %v275_v31, %v267_v30 }
 0x1da   :  { %1508 = vtanh.f32 %v277_v32 }
 0x1e4   :  { %v1509_v33 = vpop.eup %1508 }
 0x1e5   :  { %280 = vrot.lane.b32.xlu1 %v1509_v33, %s1593_s17 }
 0x257   :  { %v281_v34 = vpop.permute.xlu1 %280 }
 0x258   :  { %v1695_v35 = vmul.f32 %v1507_v27, %v281_v34 }
 0x25a   :  { %306 = vrot.lane.b32.xlu1 %v1695_v35, %s1594_s3 }
 0x2cc   :  { %v307_v36 = vpop.permute.xlu1 %306 }
 0x2cd   :  { %1355 = vmatmul.mubr.msk.f32.vlgmr.msra.gmra.mrb[2].mxu1 %vm43_vm0, %v307_v36 }
 0x2ce   :  { %1462 = vmatpush3.bf16.msra.mxu1 %v1650_v8  ;;  %1376 = vmatprep.mubr.msk.f32.mxu1 %vm1591_vm1, %v1592_v13 }
 0x2cf   :  { %1463 = vmatprep.subr.bf16.mxu1 %v1590_v4 }
 0x2d2   :  { %1465 = vmatpush3.bf16.msra.mxu1 %v1665_v14 }
 0x2d3   :  { %1472 = vmatprep.subr.bf16.mxu1 %v1590_v4 }
 0x3a0   :  { %v376_v38 = vpop.f32.mrb[2].mxu1 }
 0x3a1   :  { %v380_v39 = vadd.f32 %v376_v38, %v140_v37  ;;  %v1356_v40 = vpop.f32.mrb[3].mxu1 }
 0x3a3   :  { %1510 = vtanh.f32 %v380_v39  ;;  %v1243_v42 = vmul.f32 -1.442695, %v380_v39 }
 0x3a5   :  { %1512 = vpow2.f32 %v1243_v42 }
 0x3ad   :  { %v1511_v41 = vpop.eup %1510 }
 0x3ae   :  { %390 = vrot.lane.b32.xlu0 %v1511_v41, %s1593_s17 }
 0x3af   :  { %v1513_v43 = vpop.eup %1512 }
 0x3b0   :  { %v384_v44 = vadd.f32 1.0, %v1513_v43 }
 0x3b2   :  { %1514 = vrcp.f32 %v384_v44 }
 0x3bc   :  { %v1515_v45 = vpop.eup %1514 }
 0x3bd   :  { %v388_v48 = vmul.f32 %v1515_v45, %v277_v32 }
 0x420   :  { %v391_v46 = vpop.permute.xlu0 %390 }
 0x421   :  { %v393_v47 = vmul.f32 %v1515_v45, %v391_v46 }
 0x423   :  { %395 = vrot.lane.b32.xlu1 %v393_v47, %s1593_s17 }
 0x495   :  { %v396_v49 = vpop.permute.xlu1 %395 }
 0x496   :  { %v398_v50 = vadd.f32 %v396_v49, %v388_v48 }
 0x498   :  { %1516 = vtanh.f32 %v398_v50 }
 0x4a2   :  { %v1517_v54 = vpop.eup %1516 }
 0x4a3   :  { %401 = vrot.lane.b32.xlu0 %v1517_v54, %s1593_s17 }
 0x515   :  { %v402_v58 = vpop.permute.xlu0 %401 }
 0x516   :  { %v1736_v59 = vmul.f32 %v1515_v45, %v402_v58  ;;  %v155_v45 = vadd.f32 %v1689_v16, %v1742_v63 }
 0x518   :  { %425 = vrot.lane.b32.xlu1 %v1736_v59, %s1594_s3 }
 0x58a   :  { %v426_v2 = vpop.permute.xlu1 %425 }
 0x58b   :  { %1366 = vmatmul.mubr.msk.f32.vlgmr.msra.gmra.mrb[8].mxu0 %vm43_vm0, %v426_v2 }
 0x58c   :  { %1468 = vmatpush3.bf16.msra.mxu0 %v1650_v8  ;;  %1387 = vmatprep.mubr.msk.f32.mxu0 %vm1591_vm1, %v1592_v13 }
 0x58d   :  { %1469 = vmatprep.subr.bf16.mxu0 %v1590_v4 }
 0x590   :  { %1471 = vmatpush3.bf16.msra.mxu0 %v1665_v14 }
 0x591   :  { %1478 = vmatprep.subr.bf16.mxu0 %v1590_v4 }
 0x65e   :  { %v495_v5 = vpop.f32.mrb[8].mxu0 }
 0x65f   :  { %v499_v6 = vadd.f32 %v495_v5, %v145_v3  ;;  %v1367_v7 = vpop.f32.mrb[9].mxu0  ;;  %v160_v3 = vadd.f32 %v1740_v62, %v1689_v16 }
 0x661   :  { %1518 = vtanh.f32 %v499_v6  ;;  %v1245_v10 = vmul.f32 -1.442695, %v499_v6 }
 0x663   :  { %1520 = vpow2.f32 %v1245_v10 }
 0x66b   :  { %v1519_v9 = vpop.eup %1518 }
 0x66c   :  { %509 = vrot.lane.b32.xlu0 %v1519_v9, %s1593_s17 }
 0x66d   :  { %v1521_v11 = vpop.eup %1520 }
 0x66e   :  { %v503_v12 = vadd.f32 1.0, %v1521_v11 }
 0x670   :  { %1522 = vrcp.f32 %v503_v12 }
 0x67a   :  { %v1523_v15 = vpop.eup %1522 }
 0x67b   :  { %v507_v19 = vmul.f32 %v1523_v15, %v398_v50 }
 0x6de   :  { %v510_v17 = vpop.permute.xlu0 %509 }
 0x6df   :  { %v512_v18 = vmul.f32 %v1523_v15, %v510_v17 }
 0x6e1   :  { %514 = vrot.lane.b32.xlu1 %v512_v18, %s1593_s17 }
 0x753   :  { %v515_v20 = vpop.permute.xlu1 %514 }
 0x754   :  { %v517_v21 = vadd.f32 %v515_v20, %v507_v19 }
 0x756   :  { %1524 = vtanh.f32 %v517_v21 }
 0x760   :  { %v1525_v22 = vpop.eup %1524 }
 0x761   :  { %520 = vrot.lane.b32.xlu0 %v1525_v22, %s1593_s17 }
 0x7d3   :  { %v521_v23 = vpop.permute.xlu0 %520 }
 0x7d4   :  { %v1759_v24 = vmul.f32 %v1523_v15, %v521_v23  ;;  %v165_v23 = vadd.f32 %v1689_v16, %v1746_v1 }
 0x7d6   :  { %544 = vrot.lane.b32.xlu1 %v1759_v24, %s1594_s3 }
 0x848   :  { %v545_v25 = vpop.permute.xlu1 %544 }
 0x849   :  { %1377 = vmatmul.mubr.msk.f32.vlgmr.msra.gmra.mrb[4].mxu1 %vm43_vm0, %v545_v25 }
 0x84a   :  { %1474 = vmatpush3.bf16.msra.mxu1 %v1650_v8  ;;  %1398 = vmatprep.mubr.msk.f32.mxu1 %vm1591_vm1, %v1592_v13 }
 0x84b   :  { %1475 = vmatprep.subr.bf16.mxu1 %v1590_v4 }
 0x84e   :  { %1477 = vmatpush3.bf16.msra.mxu1 %v1665_v14 }
 0x84f   :  { %1484 = vmatprep.subr.bf16.mxu1 %v1590_v4 }
 0x91c   :  { %v614_v27 = vpop.f32.mrb[4].mxu1 }
 0x91d   :  { %v618_v28 = vadd.f32 %v614_v27, %v150_v26  ;;  %v1378_v29 = vpop.f32.mrb[5].mxu1 }
 0x91f   :  { %1526 = vtanh.f32 %v618_v28  ;;  %v1247_v31 = vmul.f32 -1.442695, %v618_v28 }
 0x921   :  { %1528 = vpow2.f32 %v1247_v31 }
 0x929   :  { %v1527_v30 = vpop.eup %1526 }
 0x92a   :  { %628 = vrot.lane.b32.xlu0 %v1527_v30, %s1593_s17 }
 0x92b   :  { %v1529_v32 = vpop.eup %1528 }
 0x92c   :  { %v622_v33 = vadd.f32 1.0, %v1529_v32 }
 0x92e   :  { %1530 = vrcp.f32 %v622_v33 }
 0x938   :  { %v1531_v34 = vpop.eup %1530 }
 0x939   :  { %v626_v38 = vmul.f32 %v1531_v34, %v517_v21 }
 0x99c   :  { %v629_v36 = vpop.permute.xlu0 %628 }
 0x99d   :  { %v631_v37 = vmul.f32 %v1531_v34, %v629_v36 }
 0x99f   :  { %633 = vrot.lane.b32.xlu1 %v631_v37, %s1593_s17 }
 0xa11   :  { %v634_v39 = vpop.permute.xlu1 %633 }
 0xa12   :  { %v636_v40 = vadd.f32 %v634_v39, %v626_v38 }
 0xa14   :  { %1532 = vtanh.f32 %v636_v40 }
 0xa1e   :  { %v1533_v41 = vpop.eup %1532 }
 0xa1f   :  { %639 = vrot.lane.b32.xlu0 %v1533_v41, %s1593_s17  ;;  %v170_v41 = vadd.f32 %v1744_v0, %v1689_v16 }
 0xa91   :  { %v640_v42 = vpop.permute.xlu0 %639 }
 0xa92   :  { %v1774_v43 = vmul.f32 %v1531_v34, %v640_v42 }
 0xa94   :  { %663 = vrot.lane.b32.xlu1 %v1774_v43, %s1594_s3 }
 0xb06   :  { %v664_v44 = vpop.permute.xlu1 %663 }
 0xb07   :  { %1388 = vmatmul.mubr.msk.f32.vlgmr.msra.gmra.mrb[10].mxu0 %vm43_vm0, %v664_v44 }
 0xb08   :  { %1480 = vmatpush3.bf16.msra.mxu0 %v1650_v8  ;;  %1409 = vmatprep.mubr.msk.f32.mxu0 %vm1591_vm1, %v1592_v13 }
 0xb09   :  { %1481 = vmatprep.subr.bf16.mxu0 %v1590_v4 }
 0xb0c   :  { %1483 = vmatpush3.bf16.msra.mxu0 %v1665_v14 }
 0xb0d   :  { %1490 = vmatprep.subr.bf16.mxu0 %v1590_v4 }
 0xbda   :  { %v733_v46 = vpop.f32.mrb[10].mxu0 }
 0xbdb   :  { %v737_v47 = vadd.f32 %v733_v46, %v155_v45  ;;  %v1389_v48 = vpop.f32.mrb[11].mxu0 }
 0xbdc   :  { %v284_v48 = vmax.f32 %v1695_v35, 0.0 }
 0xbdd   :  { %1534 = vtanh.f32 %v737_v47  ;;  %v1249_v50 = vmul.f32 -1.442695, %v737_v47 }
 0xbdf   :  { %1536 = vpow2.f32 %v1249_v50  ;;  %v524_v50 = vmax.f32 %v1759_v24, 0.0 }
 0xbe1   :  { %v525_v16 = vsel %vm285_vm2, %v524_v50, -inf }
 0xbe7   :  { %v1535_v49 = vpop.eup %1534 }
 0xbe8   :  { %747 = vrot.lane.b32.xlu0 %v1535_v49, %s1593_s17  ;;  %v286_v49 = vsel %vm285_vm2, %v284_v48, -inf }
 0xbe9   :  { %v1537_v51 = vpop.eup %1536 }
 0xbea   :  { %v741_v52 = vadd.f32 1.0, %v1537_v51 }
 0xbec   :  { %1538 = vrcp.f32 %v741_v52  ;;  %v287_v52 = vrot.slane %v286_v49, 4 }
 0xbf6   :  { %v1539_v53 = vpop.eup %1538 }
 0xbf7   :  { %v745_v56 = vmul.f32 %v1539_v53, %v636_v40 }
 0xc5a   :  { %v748_v54 = vpop.permute.xlu0 %747 }
 0xc5b   :  { %v750_v55 = vmul.f32 %v1539_v53, %v748_v54  ;;  %v288_v54 = vmax.f32 %v286_v49, %v287_v52 }
 0xc5d   :  { %752 = vrot.lane.b32.xlu1 %v750_v55, %s1593_s17  ;;  %v526_v55 = vrot.slane %v525_v16, 4 }
 0xc5f   :  { %v527_v35 = vmax.f32 %v525_v16, %v526_v55  ;;  %v1133_v55 = vld [vmem:[%s1896_s4] sm:$0xff] }
 0xc61   :  { %v528_v24 = vrot.slane %v527_v35, 2 }
 0xccf   :  { %v753_v57 = vpop.permute.xlu1 %752 }
 0xcd0   :  { %v755_v58 = vadd.f32 %v753_v57, %v745_v56 }
 0xcd2   :  { %1540 = vtanh.f32 %v755_v58 }
 0xcdc   :  { %v1541_v60 = vpop.eup %1540 }
 0xcdd   :  { %758 = vrot.lane.b32.xlu0 %v1541_v60, %s1593_s17 }
 0xd4f   :  { %v759_v61 = vpop.permute.xlu0 %758 }
 0xd50   :  { %v1790_v63 = vmul.f32 %v1539_v53, %v759_v61 }
 0xd52   :  { %782 = vrot.lane.b32.xlu1 %v1790_v63, %s1594_s3  ;;  %v762_v0 = vmax.f32 %v1790_v63, 0.0 }
 0xd54   :  { %v763_v56 = vsel %vm285_vm2, %v762_v0, -inf }
 0xd55   :  { %v764_v60 = vrot.slane %v763_v56, 4 }
 0xdc4   :  { %v783_v2 = vpop.permute.xlu1 %782 }
 0xdc5   :  { %1399 = vmatmul.mubr.msk.f32.vlgmr.msra.gmra.mrb[6].mxu1 %vm43_vm0, %v783_v2 }
 0xdc6   :  { %1486 = vmatpush3.bf16.msra.mxu1 %v1650_v8  ;;  %1420 = vmatprep.mubr.msk.f32.mxu1 %vm1591_vm1, %v1592_v13 }
 0xdc7   :  { %1487 = vmatprep.subr.bf16.mxu1 %v1590_v4 }
 0xdca   :  { %1489 = vmatpush3.bf16.msra.mxu1 %v1665_v14 }
 0xe98   :  { %v852_v5 = vpop.f32.mrb[6].mxu1 }
 0xe99   :  { %v856_v6 = vadd.f32 %v852_v5, %v160_v3  ;;  %v1400_v7 = vpop.f32.mrb[7].mxu1  ;;  %v765_v3 = vmax.f32 %v763_v56, %v764_v60  ;;  %v1134_v56 = vld [vmem:[%s1896_s4 + $0x8] sm:$0xff]  ;;  %v1135_v60 = vld [vmem:[%s1896_s4 + $0x10] sm:$0xff] }
 0xe9b   :  { %1542 = vtanh.f32 %v856_v6  ;;  %v1251_v10 = vmul.f32 -1.442695, %v856_v6 }
 0xe9d   :  { %1544 = vpow2.f32 %v1251_v10 }
 0xea5   :  { %v1543_v9 = vpop.eup %1542 }
 0xea6   :  { %866 = vrot.lane.b32.xlu0 %v1543_v9, %s1593_s17  ;;  %v766_v9 = vrot.slane %v765_v3, 2 }
 0xea7   :  { %v1545_v8 = vpop.eup %1544 }
 0xea8   :  { %v860_v11 = vadd.f32 1.0, %v1545_v8 }
 0xeaa   :  { %1546 = vrcp.f32 %v860_v11  ;;  %v529_v11 = vmax.f32 %v527_v35, %v528_v24 }
 0xeb4   :  { %v1547_v12 = vpop.eup %1546 }
 0xeb5   :  { %v864_v14 = vmul.f32 %v1547_v12, %v755_v58  ;;  %v289_v58 = vrot.slane %v288_v54, 2 }
 0xeb7   :  { %v290_v2 = vmax.f32 %v288_v54, %v289_v58  ;;  %v1491_v58 = vpack.c.bf16 %v1134_v56, %v1133_v55 }
 0xeb9   :  { %v291_v63 = vrot.slane %v290_v2, 1 }
 0xf18   :  { %v867_v15 = vpop.permute.xlu0 %866 }
 0xf19   :  { %v869_v17 = vmul.f32 %v1547_v12, %v867_v15  ;;  %v292_v15 = vmax.f32 %v290_v2, %v291_v63 }
 0xf1b   :  { %871 = vrot.lane.b32.xlu1 %v869_v17, %s1593_s17  ;;  %v530_v17 = vrot.slane %v529_v11, 1 }
 0xf8d   :  { %v872_v18 = vpop.permute.xlu1 %871 }
 0xf8e   :  { %v874_v62 = vadd.f32 %v872_v18, %v864_v14  ;;  %v767_v14 = vmax.f32 %v765_v3, %v766_v9  ;;  %v531_v18 = vmax.f32 %v529_v11, %v530_v17 }
 0xf90   :  { %1548 = vtanh.f32 %v874_v62 }
 0xf9a   :  { %v1549_v19 = vpop.eup %1548 }
 0xf9b   :  { %877 = vrot.lane.b32.xlu0 %v1549_v19, %s1593_s17 }
0x100d   :  { %v878_v20 = vpop.permute.xlu0 %877 }
0x100e   :  { %v1805_v21 = vmul.f32 %v1547_v12, %v878_v20 }
0x1010   :  { %901 = vrot.lane.b32.xlu1 %v1805_v21, %s1594_s3 }
0x1082   :  { %v902_v22 = vpop.permute.xlu1 %901 }
0x1083   :  { %1410 = vmatmul.mubr.msk.f32.vlgmr.msra.gmra.mrb[12].mxu0 %vm43_vm0, %v902_v22 }
0x1084   :  { %1431 = vmatprep.mubr.msk.f32.mxu0 %vm1591_vm1, %v1592_v13  ;;  %1492 = vmatpush3.bf16.msra.mxu0 %v1491_v58 }
0x1085   :  { %1493 = vmatprep.subr.bf16.mxu0 %v1590_v4  ;;  %v1256_v4 = vld [vmem:[%s1897_s5] ss:$0 sm:$0xff] }
0x1156   :  { %v971_v25 = vpop.f32.mrb[12].mxu0 }
0x1157   :  { %v975_v26 = vadd.f32 %v971_v25, %v165_v23  ;;  %v1411_v27 = vpop.f32.mrb[13].mxu0  ;;  %v405_v25 = vmax.f32 %v1736_v59, 0.0 }
0x1158   :  { %v643_v27 = vmax.f32 %v1774_v43, 0.0 }
0x1159   :  { %1550 = vtanh.f32 %v975_v26  ;;  %v1253_v29 = vmul.f32 -1.442695, %v975_v26  ;;  %v406_v26 = vsel %vm285_vm2, %v405_v25, -inf }
0x115b   :  { %1552 = vpow2.f32 %v1253_v29  ;;  %v644_v29 = vsel %vm285_vm2, %v643_v27, -inf }
0x1163   :  { %v1551_v28 = vpop.eup %1550 }
0x1164   :  { %985 = vrot.lane.b32.xlu0 %v1551_v28, %s1593_s17  ;;  %v407_v28 = vrot.slane %v406_v26, 4 }
0x1165   :  { %v1553_v30 = vpop.eup %1552 }
0x1166   :  { %v979_v31 = vadd.f32 1.0, %v1553_v30  ;;  %v881_v30 = vmax.f32 %v1805_v21, 0.0 }
0x1168   :  { %1554 = vrcp.f32 %v979_v31 }
0x1172   :  { %v1555_v32 = vpop.eup %1554 }
0x1173   :  { %v983_v13 = vmul.f32 %v1555_v32, %v874_v62  ;;  %v768_v62 = vrot.slane %v767_v14, 1 }
0x1175   :  { %v769_v20 = vmax.f32 %v767_v14, %v768_v62 }
0x11d6   :  { %v986_v33 = vpop.permute.xlu0 %985 }
0x11d7   :  { %v988_v34 = vmul.f32 %v1555_v32, %v986_v33  ;;  %v645_v33 = vrot.slane %v644_v29, 4 }
0x11d9   :  { %990 = vrot.lane.b32.xlu1 %v988_v34, %s1593_s17 }
0x124b   :  { %v991_v36 = vpop.permute.xlu1 %990 }
0x124c   :  { %v1816_v1 = vadd.f32 %v991_v36, %v983_v13  ;;  %v882_v13 = vsel %vm285_vm2, %v881_v30, -inf }
0x124e   :  { %1556 = vtanh.f32 %v1816_v1 }
0x1258   :  { %v1557_v37 = vpop.eup %1556 }
0x1259   :  { %996 = vrot.lane.b32.xlu0 %v1557_v37, %s1593_s17  ;;  %v646_v37 = vmax.f32 %v644_v29, %v645_v33 }
0x12cb   :  { %v997_v38 = vpop.permute.xlu0 %996 }
0x12cc   :  { %v999_v39 = vmul.f32 %v1555_v32, %v997_v38  ;;  %v408_v32 = vmax.f32 %v406_v26, %v407_v28  ;;  %v883_v38 = vrot.slane %v882_v13, 4 }
0x12ce   :  { %1020 = vrot.lane.b32.xlu1 %v999_v39, %s1594_s3  ;;  %v1000_v57 = vmax.f32 %v999_v39, 0.0  ;;  %v409_v59 = vrot.slane %v408_v32, 2  ;;  %v647_v39 = vrot.slane %v646_v37, 2 }
0x12d0   :  { %v1001_v61 = vsel %vm285_vm2, %v1000_v57, -inf }
0x12d1   :  { %v1002_v5 = vrot.slane %v1001_v61, 4 }
0x12d3   :  { %v1003_v10 = vmax.f32 %v1001_v61, %v1002_v5  ;;  %v1136_v61 = vld [vmem:[%s1896_s4 + $0x18] sm:$0xff] }
0x12d4   :  { %v1494_v24 = vpack.c.bf16 %v1136_v61, %v1135_v60 }
0x12d5   :  { %v1004_v12 = vrot.slane %v1003_v10, 2 }
0x12d6   :  { %1495 = vmatpush3.bf16.msra.mxu0 %v1494_v24 }
0x12d7   :  { %v1005_v19 = vmax.f32 %v1003_v10, %v1004_v12 }
0x12d9   :  { %v1006_v22 = vrot.slane %v1005_v19, 1 }
0x12db   :  { %v1007_v23 = vmax.f32 %v1005_v19, %v1006_v22 }
0x1340   :  { %v1021_v40 = vpop.permute.xlu1 %1020 }
0x1341   :  { %1421 = vmatmul.mubr.msk.f32.vlgmr.msra.gmra.mrb[8].mxu1 %vm43_vm0, %v1021_v40  ;;  %v884_v40 = vmax.f32 %v882_v13, %v883_v38 }
0x1414   :  { %v1090_v42 = vpop.f32.mrb[8].mxu1 }
0x1415   :  { %v1094_v44 = vadd.f32 %v1090_v42, %v170_v41  ;;  %v1422_v45 = vpop.f32.mrb[9].mxu1  ;;  %v410_v41 = vmax.f32 %v408_v32, %v409_v59 }
0x1416   :  { %v648_v45 = vmax.f32 %v646_v37, %v647_v39 }
0x1417   :  { %1558 = vtanh.f32 %v1094_v44  ;;  %v1255_v47 = vmul.f32 -1.442695, %v1094_v44  ;;  %v411_v44 = vrot.slane %v410_v41, 1 }
0x1418   :  { %v649_v49 = vrot.slane %v648_v45, 1 }
0x1419   :  { %1560 = vpow2.f32 %v1255_v47  ;;  %v412_v48 = vmax.f32 %v410_v41, %v411_v44 }
0x1421   :  { %v1559_v46 = vpop.eup %1558 }
0x1422   :  { %1104 = vrot.lane.b32.xlu0 %v1559_v46, %s1593_s17 }
0x1423   :  { %v1561_v51 = vpop.eup %1560 }
0x1424   :  { %v1098_v53 = vadd.f32 1.0, %v1561_v51  ;;  %v650_v51 = vmax.f32 %v648_v45, %v649_v49 }
0x1426   :  { %1562 = vrcp.f32 %v1098_v53 }
0x1430   :  { %v1832_v6 = vpop.eup %1562 }
0x1431   :  { %v1102_v31 = vmul.f32 %v1832_v6, %v1816_v1  ;;  %v885_v1 = vrot.slane %v884_v40, 2 }
0x1433   :  { %v886_v50 = vmax.f32 %v884_v40, %v885_v1 }
0x1435   :  { %v887_v52 = vrot.slane %v886_v50, 1 }
0x1437   :  { %v888_v16 = vmax.f32 %v886_v50, %v887_v52 }
0x1494   :  { %v1105_v7 = vpop.permute.xlu0 %1104 }
0x1495   :  { %v1107_v8 = vmul.f32 %v1832_v6, %v1105_v7 }
0x1497   :  { %1109 = vrot.lane.b32.xlu1 %v1107_v8, %s1593_s17 }
0x149b   :  { %294 = vrot.lane.b32.xlu1 %v292_v15, %s1594_s3 }
0x149f   :  { %533 = vrot.lane.b32.xlu1 %v531_v18, %s1594_s3 }
0x14a3   :  { %771 = vrot.lane.b32.xlu1 %v769_v20, %s1594_s3 }
0x14a7   :  { %1009 = vrot.lane.b32.xlu1 %v1007_v23, %s1594_s3 }
0x1509   :  { %v1110_v34 = vpop.permute.xlu1 %1109 }
0x150a   :  { %v1112_v36 = vadd.f32 %v1110_v34, %v1102_v31 }
0x150c   :  { %1564 = vtanh.f32 %v1112_v36 }
0x150d   :  { %v295_v43 = vpop.permute.xlu1 %294 }
0x150e   :  { %298 = vst.msk [vmem:[#allocation3] sm:$0x1] %vm297_vm3, %v295_v43 }
0x1511   :  { %v534_v21 = vpop.permute.xlu1 %533 }
0x1512   :  { %536 = vst.msk [vmem:[#allocation3 + $0x2] sm:$0x1] %vm297_vm3, %v534_v21 }
0x1515   :  { %v772_v42 = vpop.permute.xlu1 %771 }
0x1516   :  { %v1565_v46 = vpop.eup %1564  ;;  %774 = vst.msk [vmem:[#allocation3 + $0x4] sm:$0x1] %vm297_vm3, %v772_v42 }
0x1517   :  { %1115 = vrot.lane.b32.xlu0 %v1565_v46, %s1593_s17 }
0x1519   :  { %v1010_v47 = vpop.permute.xlu1 %1009 }
0x151a   :  { %1012 = vst.msk [vmem:[#allocation3 + $0x6] sm:$0x1] %vm297_vm3, %v1010_v47 }
0x151b   :  { %414 = vrot.lane.b32.xlu0 %v412_v48, %s1594_s3 }
0x151f   :  { %652 = vrot.lane.b32.xlu0 %v650_v51, %s1594_s3 }
0x1523   :  { %890 = vrot.lane.b32.xlu0 %v888_v16, %s1594_s3 }
0x1589   :  { %v1116_v0 = vpop.permute.xlu0 %1115 }
0x158a   :  { %v1118_v53 = vmul.f32 %v1832_v6, %v1116_v0 }
0x158c   :  { %v1119_v54 = vmax.f32 %v1118_v53, 0.0 }
0x158d   :  { %v415_v57 = vpop.permute.xlu0 %414 }
0x158e   :  { %v1120_v35 = vsel %vm285_vm2, %v1119_v54, -inf  ;;  %417 = vst.msk [vmem:[#allocation3 + $0x1] sm:$0x1] %vm297_vm3, %v415_v57 }
0x158f   :  { %v1121_v2 = vrot.slane %v1120_v35, 4 }
0x1591   :  { %v1122_v3 = vmax.f32 %v1120_v35, %v1121_v2  ;;  %v653_v5 = vpop.permute.xlu0 %652 }
0x1592   :  { %655 = vst.msk [vmem:[#allocation3 + $0x3] sm:$0x1] %vm297_vm3, %v653_v5 }
0x1593   :  { %v1123_v6 = vrot.slane %v1122_v3, 2 }
0x1595   :  { %v891_v7 = vpop.permute.xlu0 %890  ;;  %v1124_v63 = vmax.f32 %v1122_v3, %v1123_v6 }
0x1596   :  { %893 = vst.msk [vmem:[#allocation3 + $0x5] sm:$0x1] %vm297_vm3, %v891_v7 }
0x1597   :  { %v1125_v9 = vrot.slane %v1124_v63, 1 }
0x1599   :  { %v1126_v10 = vmax.f32 %v1124_v63, %v1125_v9 }
0x159b   :  { %1128 = vrot.lane.b32.xlu0 %v1126_v10, %s1594_s3 }
0x160d   :  { %v1129_v8 = vpop.permute.xlu0 %1128 }
0x160e   :  { %1131 = vst.msk [vmem:[#allocation3 + $0x7] sm:$0x1] %vm297_vm3, %v1129_v8 }
0x1615   :  { %v1132_v11 = vld [vmem:[#allocation3] sm:$0xff] }
0x1616   :  { %1432 = vmatmul.mubr.msk.f32.vlgmr.msra.gmra.mrb[14].mxu0 %vm43_vm0, %v1132_v11 }
0x16e9   :  { %v1213_v12 = vpop.f32.mrb[14].mxu0 }
0x16ea   :  { %v1214_v15 = vadd.f32 %v1256_v4, %v1213_v12  ;;  %v1433_v17 = vpop.f32.mrb[15].mxu0 }
0x16ec   :  { %1217 = vst [vmem:[#allocation4] sm:$0xff] %v1214_v15 }
0x16ed   :  { %1577 = shalt.err (!%p1574_p4)
}
0x16ee   :  { %s1578_s17 = scalar_lea.hbm %s1898_s6, 128 }
0x16ef   :  { %p1579_p5 = scmp.ne.s32.totalorder %s1898_s6, %s1578_s17  ;;  %p1582_p6 = scmp.lt.u32.totalorder %s1578_s17, %s1898_s6 }
0x16f1   :  { %p1584_p7 = pnand %p1582_p6, %p1579_p5 }
0x16f3   :  { %1587 = shalt.err (!%p1584_p7)
}
0x16f4   :  { %1227 = dma.vmem_to_hbm [thread:$0]  %s1225_s1, 128, %s1898_s6, [#allocation5]  }
0x16f5   :  { %1588 = dma.done.wait [#allocation5], 128  }
0x16f6   :  { %1589 = vsyncadd [#allocation5], 4294967168 }
0x16f7   :  { %1231 = vsyncpa [#allocation5], 1 }

</bundles_post_ra>
